<compile_context>
chip_gen: v7x
topology: tpu7x:2x2x1
jax: 0.10.0
libtpu: 0.0.40
codegen_flags: <defaults>
</compile_context>

<pallas_src>
import jax
import jax.numpy as jnp
from jax.experimental import pallas as pl
from jax.experimental.pallas import tpu as pltpu


def arma_kernel(x_ref, w_ref, b_ref, o_ref):
    # x_ref: (TB, T, M)   w_ref: (T, M)   b_ref: (1, M)   o_ref: (TB, M)
    x = x_ref[...]
    w = w_ref[...]
    # weighted sum over the time axis (sublane reduction) + bias broadcast
    o_ref[...] = jnp.sum(x * w[None, :, :], axis=1) + b_ref[...]


def _effective_weight(weight, T):
    """Fold the 2-point moving average into the per-timestep weights.

    cat([x, ma]) * weight summed over time is algebraically identical to
    x * w_eff summed over time, with
        w_eff[t] = w[t] + 0.5*w_ma[t-1]  (t >= 1)   [x[t] appears in ma[t-1]]
                        + 0.5*w_ma[t]    (t <= T-2) [x[t] appears in ma[t]]
    """
    w_x = weight[:T]            # (T, M)   weights on the raw series
    w_ma = 0.5 * weight[T:]     # (T-1, M) weights on the moving average, pre-halved
    w_eff = w_x
    w_eff = w_eff.at[:-1].add(w_ma)   # contribution of x[t] through ma[t]
    w_eff = w_eff.at[1:].add(w_ma)    # contribution of x[t] through ma[t-1]
    return w_eff                       # (T, M)


def arma_forward(x, weight, bias, *, block_b=512):
    """x: (B, T, M) f32; weight: (2T-1, M); bias: (M,). Returns ((B, M), None)."""
    B, T, M = x.shape
    W = weight.shape[0]
    assert W == 2 * T - 1, "weight must have 2*window-1 rows (n=2 ARMA)"

    w_eff = _effective_weight(weight, T)          # (T, M)
    bias2d = bias.reshape(1, M)

    # Batch blocking: TB batches per grid step (amortizes per-step pipeline
    # overhead).  Pad B to a multiple of TB with zeros; padded rows are sliced
    # off the output below (they only ever see bias, never the real output).
    # Note (v7x): with realistic B, grid has >= 2 steps so work shards across
    # both TensorCores via the "parallel" dimension semantics.
    TB = min(block_b, B)
    grid_b = pl.cdiv(B, TB)
    B_pad = grid_b * TB
    if B_pad != B:
        x = jnp.pad(x, ((0, B_pad - B), (0, 0), (0, 0)))

    out = pl.pallas_call(
        arma_kernel,
        out_shape=jax.ShapeDtypeStruct((B_pad, M), x.dtype),
        grid_spec=pltpu.PrefetchScalarGridSpec(
            num_scalar_prefetch=0,
            grid=(grid_b,),
            in_specs=[
                pl.BlockSpec((TB, T, M), lambda b: (b, 0, 0)),   # x, batch-blocked
                pl.BlockSpec((T, M), lambda b: (0, 0)),          # w_eff (VMEM-resident)
                pl.BlockSpec((1, M), lambda b: (0, 0)),          # bias (VMEM-resident)
            ],
            out_specs=pl.BlockSpec((TB, M), lambda b: (b, 0)),
        ),
        compiler_params=pltpu.CompilerParams(
            dimension_semantics=("parallel",),
        ),
    )(x, w_eff, bias2d)

    if B_pad != B:
        out = out[:B]
    return out, None


def _reference(x, weight, bias):
    # pure-JAX reference mirroring the PyTorch forward (cumsum trick, n=2)
    B, T, M = x.shape
    xt = jnp.transpose(x, (0, 2, 1))                      # (B, M, T)
    cs = jnp.cumsum(xt, axis=-1)
    cs = cs.at[:, :, 2:].set(cs[:, :, 2:] - cs[:, :, :-2])
    ma = cs[:, :, 1:] / 2.0                               # (B, M, T-1)
    ma = jnp.transpose(ma, (0, 2, 1))                     # (B, T-1, M)
    cat = jnp.concatenate([x, ma], axis=1)                # (B, 2T-1, M)
    return jnp.sum(cat * weight[None], axis=1) + bias


if __name__ == "__main__":
    B, T, M = 2, 8, 32          # batch, window, num_series
    W = 2 * T - 1               # concatenated time length (n = 2)

    key = jax.random.PRNGKey(0)
    kx, kw = jax.random.split(key)

    x = jax.random.normal(kx, (B, T, M), dtype=jnp.float32)

    # xavier_normal init for weight (fan_in = M, fan_out = W), bias = zeros
    std = (2.0 / (W + M)) ** 0.5
    weight = std * jax.random.normal(kw, (W, M), dtype=jnp.float32)
    bias = jnp.zeros((M,), dtype=jnp.float32)

    out, _none = arma_forward(x, weight, bias)
    out = jax.block_until_ready(out)

    ref = _reference(x, weight, bias)
    assert out.shape == (B, M)
    assert jnp.allclose(out, ref, atol=1e-5, rtol=1e-5)

    print("KERNEL_OK")
</pallas_src>

<mosaic_0001>
module attributes {stable_mosaic.version = 11 : i64} {
  func.func @arma_kernel(%arg0: i32, %arg1: memref<2x8x32xf32, #tpu.memory_space<vmem>>, %arg2: memref<8x32xf32, #tpu.memory_space<vmem>>, %arg3: memref<1x32xf32, #tpu.memory_space<vmem>>, %arg4: memref<2x32xf32, #tpu.memory_space<vmem>>) attributes {dimension_semantics = [#tpu.dimension_semantics<parallel>], iteration_bounds = array<i64: 1>, scalar_prefetch = 0 : i64, scratch_operands = 0 : i64, tpu.core_type = #tpu.core_type<tc>, window_params = [{transform_indices = @transform_0, window_bounds = array<i64: 2, 8, 32>}, {pipeline_mode = #tpu.pipeline_mode<synchronous>, transform_indices = @transform_1, window_bounds = array<i64: 8, 32>}, {pipeline_mode = #tpu.pipeline_mode<synchronous>, transform_indices = @transform_2, window_bounds = array<i64: 1, 32>}, {transform_indices = @transform_3, window_bounds = array<i64: 2, 32>}]} {
    %c0 = arith.constant 0 : index
    %c0_0 = arith.constant 0 : index
    %c0_1 = arith.constant 0 : index
    %0 = vector.load %arg1[%c0, %c0_0, %c0_1] : memref<2x8x32xf32, #tpu.memory_space<vmem>>, vector<2x8x32xf32>
    %c0_2 = arith.constant 0 : index
    %c0_3 = arith.constant 0 : index
    %1 = vector.load %arg2[%c0_2, %c0_3] : memref<8x32xf32, #tpu.memory_space<vmem>>, vector<8x32xf32>
    %2 = vector.shape_cast %1 : vector<8x32xf32> to vector<1x8x32xf32>
    %3 = vector.broadcast %2 : vector<1x8x32xf32> to vector<2x8x32xf32>
    %4 = arith.mulf %0, %3 : vector<2x8x32xf32>
    %cst = arith.constant dense<0.000000e+00> : vector<2x32xf32>
    %5 = vector.multi_reduction <add>, %4, %cst [1] : vector<2x8x32xf32> to vector<2x32xf32>
    %c0_4 = arith.constant 0 : index
    %c0_5 = arith.constant 0 : index
    %6 = vector.load %arg3[%c0_4, %c0_5] : memref<1x32xf32, #tpu.memory_space<vmem>>, vector<1x32xf32>
    %7 = vector.broadcast %6 : vector<1x32xf32> to vector<2x32xf32>
    %8 = arith.addf %5, %7 : vector<2x32xf32>
    %c0_6 = arith.constant 0 : index
    %c0_7 = arith.constant 0 : index
    %9 = vector.load %arg4[%c0_6, %c0_7] : memref<2x32xf32, #tpu.memory_space<vmem>>, vector<2x32xf32>
    tpu.vector_store %arg4[%c0_6, %c0_7], %8 {strides = array<i32>} : memref<2x32xf32, #tpu.memory_space<vmem>>, vector<2x32xf32>,
    return
  }
  func.func @transform_0(%arg0: i32) -> (i32, i32, i32) {
    %c0_i32 = arith.constant 0 : i32
    %c0_i32_0 = arith.constant 0 : i32
    %c0_i32_1 = arith.constant 0 : i32
    return %arg0, %c0_i32, %c0_i32_0 : i32, i32, i32
  }
  func.func @transform_1(%arg0: i32) -> (i32, i32) {
    %c0_i32 = arith.constant 0 : i32
    %c0_i32_0 = arith.constant 0 : i32
    %c0_i32_1 = arith.constant 0 : i32
    return %c0_i32, %c0_i32_0 : i32, i32
  }
  func.func @transform_2(%arg0: i32) -> (i32, i32) {
    %c0_i32 = arith.constant 0 : i32
    %c0_i32_0 = arith.constant 0 : i32
    %c0_i32_1 = arith.constant 0 : i32
    return %c0_i32, %c0_i32_0 : i32, i32
  }
  func.func @transform_3(%arg0: i32) -> (i32, i32) {
    %c0_i32 = arith.constant 0 : i32
    %c0_i32_0 = arith.constant 0 : i32
    return %arg0, %c0_i32 : i32, i32
  }
}

</mosaic_0001>

<bundles_post_ra>
// kernel: tpu_custom_call.1
= control target key start
LH: loop header
LB: loop body
LE: loop exit
PB: predicated region body
PF: predicated region fallthrough
CT: control target
= control target key end

     0   :  { %8 = vsyncpa [#allocation3], 0  ;;  %s236_s0 = inlined_call_operand.hbm [shape: f32[2,8,32], index: 0, kind: input, shape index: {}]   ;;  %s237_s1 = inlined_call_operand.hbm [shape: f32[8,32], index: 1, kind: input, shape index: {}]   ;;  %s238_s2 = inlined_call_operand.vmem [shape: f32[1,32], index: 2, kind: input, shape index: {}]   ;;  %s239_s3 = inlined_call_operand.hbm [shape: f32[2,32], index: 3, kind: output, shape index: {}]  }
   0x1   :  { %9 = vsyncpa [#allocation6], 0 }
   0x2   :  { %10 = vsyncpa [#allocation4], 0  ;;  %s172_s12 = smov [#allocation2]   ;;  %s100_s16 = scalar_lea.hbm %s236_s0, 256 }
   0x3   :  { %s16_s13 = sshll.u32 %s172_s12, 4  ;;  %p101_p0 = scmp.ne.s32.totalorder %s236_s0, %s100_s16  ;;  %s17_s13 = int_to_ptr.vmem [resolvable:$true] %s16_s13 }
   0x4   :  { %p104_p1 = scmp.lt.u32.totalorder %s100_s16, %s236_s0 }
   0x6   :  { %p106_p2 = pnand %p104_p1, %p101_p0 }
   0x8   :  { %109 = shalt.err (!%p106_p2)
}
   0x9   :  { %s110_s21 = scalar_lea.vmem %s17_s13, 256  ;;  %p115_p4 = scmp.lt.s32.totalorder %s17_s13, %s17_s13 }
   0xa   :  { %p111_p3 = scmp.ne.s32.totalorder %s17_s13, %s110_s21  ;;  %p116_p5 = scmp.lt.s32.totalorder %s110_s21, %s110_s21 }
   0xc   :  { %p117_p6 = por %p116_p5, %p115_p4 }
   0xe   :  { %p118_p7 = pnand %p117_p6, %p111_p3 }
  0x10   :  { %121 = shalt.err (!%p118_p7)
}
  0x11   :  { %s173_s22 = smov 128   ;;  %s174_s23 = smov 8  }
  0x12   :  { %22 = dma.hbm_to_vmem [thread:$0]  %s236_s0, 256, %s17_s13, [#allocation3], %s173_s22, %s173_s22, %s174_s23  }
  0x13   :  { %s175_s26 = smov [#allocation5]   ;;  %s122_s30 = scalar_lea.hbm %s237_s1, 128 }
  0x14   :  { %s29_s27 = sshll.u32 %s175_s26, 4  ;;  %p123_p8 = scmp.ne.s32.totalorder %s237_s1, %s122_s30  ;;  %s30_s27 = int_to_ptr.vmem [resolvable:$true] %s29_s27 }
  0x15   :  { %p126_p9 = scmp.lt.u32.totalorder %s122_s30, %s237_s1 }
  0x17   :  { %p128_p10 = pnand %p126_p9, %p123_p8 }
  0x19   :  { %131 = shalt.err (!%p128_p10)
}
  0x1a   :  { %s132_s8 = scalar_lea.vmem %s30_s27, 128  ;;  %p137_p12 = scmp.lt.s32.totalorder %s30_s27, %s30_s27 }
  0x1b   :  { %p133_p11 = scmp.ne.s32.totalorder %s30_s27, %s132_s8  ;;  %p138_p13 = scmp.lt.s32.totalorder %s132_s8, %s132_s8 }
  0x1d   :  { %p139_p0 = por %p138_p13, %p137_p12 }
  0x1f   :  { %p140_p1 = pnand %p139_p0, %p133_p11 }
  0x21   :  { %143 = shalt.err (!%p140_p1)
}
  0x22   :  { %32 = dma.hbm_to_vmem [thread:$0]  %s237_s1, 128, %s30_s27, [#allocation6]  }
  0x23   :  { %166 = dma.done.wait [#allocation3], 256  }
  0x24   :  { %167 = vsyncadd [#allocation3], 4294967040 }
  0x25   :  { %168 = dma.done.wait [#allocation6], 128  }
  0x26   :  { %169 = vsyncadd [#allocation6], 4294967168  ;;  %v41_v0 = vld [vmem:[#allocation2] sm:$0xff]  ;;  %v42_v1 = vld [vmem:[#allocation2 + $0x8] sm:$0xff]  ;;  %vm46_vm0 = vcmask 261120   ;;  %s176_s11 = smov [#allocation7]  }
  0x27   :  { %v43_v2 = vld [vmem:[#allocation5] sm:$0xff]  ;;  %v94_v17 = vld [vmem:[%s238_s2] ss:$0 sm:$0xff]  ;;  %s84_s12 = sshll.u32 %s176_s11, 4  ;;  %vm73_vm1 = vcmask 1041409   ;;  %vm76_vm2 = vcmask 254976   ;;  %s85_s12 = int_to_ptr.vmem [resolvable:$true] %s84_s12 }
  0x28   :  { %v44_v3 = vmul.f32 %v43_v2, %v41_v0  ;;  %v45_v4 = vmul.f32 %v43_v2, %v42_v1  ;;  %s144_s13 = scalar_lea.vmem %s85_s12, 32  ;;  %p149_p3 = scmp.lt.s32.totalorder %s85_s12, %s85_s12 }
  0x29   :  { %p145_p2 = scmp.ne.s32.totalorder %s85_s12, %s144_s13  ;;  %p150_p4 = scmp.lt.s32.totalorder %s144_s13, %s144_s13 }
  0x2a   :  { %v47_v5 = vsel %vm46_vm0, %v44_v3, 0.0  ;;  %v54_v6 = vsel %vm46_vm0, %v45_v4, 0.0 }
  0x2b   :  { %v48_v7 = vrot.slane %v47_v5, 4  ;;  %v55_v8 = vrot.slane %v54_v6, 4  ;;  %p151_p5 = por %p150_p4, %p149_p3 }
  0x2d   :  { %v49_v9 = vadd.f32 %v48_v7, %v47_v5  ;;  %v56_v10 = vadd.f32 %v55_v8, %v54_v6  ;;  %p152_p6 = pnand %p151_p5, %p145_p2 }
  0x2f   :  { %v50_v11 = vrot.slane %v49_v9, 2  ;;  %v57_v12 = vrot.slane %v56_v10, 2 }
  0x31   :  { %v51_v13 = vadd.f32 %v50_v11, %v49_v9  ;;  %v58_v14 = vadd.f32 %v57_v12, %v56_v10 }
  0x33   :  { %v52_v15 = vrot.slane %v51_v13, 1  ;;  %v59_v16 = vrot.slane %v58_v14, 1 }
  0x35   :  { %v53_v18 = vadd.f32 %v52_v15, %v51_v13  ;;  %v60_v19 = vadd.f32 %v59_v16, %v58_v14 }
  0x37   :  { %v68_v20 = vadd.f32 %v94_v17, %v53_v18  ;;  %v69_v21 = vadd.f32 %v94_v17, %v60_v19 }
  0x39   :  { %v72_v22 = vrot.slane %v69_v21, 7 }
  0x3b   :  { %v74_v23 = vsel %vm73_vm1, %v72_v22, %v68_v20 }
  0x3c   :  { %77 = vst.msk [vmem:[#allocation7] sm:$0x3] %vm76_vm2, %v74_v23 }
  0x3d   :  { %155 = shalt.err (!%p152_p6)
}
  0x3e   :  { %s156_s15 = scalar_lea.hbm %s239_s3, 32 }
  0x3f   :  { %p157_p7 = scmp.ne.s32.totalorder %s239_s3, %s156_s15  ;;  %p160_p8 = scmp.lt.u32.totalorder %s156_s15, %s239_s3 }
  0x41   :  { %p162_p9 = pnand %p160_p8, %p157_p7 }
  0x43   :  { %165 = shalt.err (!%p162_p9)
}
  0x44   :  { %87 = dma.vmem_to_hbm [thread:$0]  %s85_s12, 32, %s239_s3, [#allocation4]  }
  0x45   :  { %170 = dma.done.wait [#allocation4], 32  }
  0x46   :  { %171 = vsyncadd [#allocation4], 4294967264 }
  0x47   :  { %91 = vsyncpa [#allocation3], 1 }
  0x48   :  { %92 = vsyncpa [#allocation6], 1 }
  0x49   :  { %93 = vsyncpa [#allocation4], 1 }

</bundles_post_ra>
